<compile_context>
chip_gen: v7x
topology: tpu7x:2x2x1
jax: 0.10.0
libtpu: 0.0.40
codegen_flags: <defaults>
</compile_context>

<pallas_src>
import functools

import jax
import jax.numpy as jnp
from jax.experimental import pallas as pl
from jax.experimental.pallas import tpu as pltpu


def _norm_kernel(x_ref, alpha_ref, bias_ref, o_ref, *, eps):
    x = x_ref[...].astype(jnp.float32)            # (tile_rows, D)
    d = x.shape[-1]

    # One-pass row statistics: the two reductions have no serial dependency.
    s = jnp.sum(x, axis=-1, keepdims=True)        # (tile_rows, 1)
    ss = jnp.sum(x * x, axis=-1, keepdims=True)   # (tile_rows, 1)
    mean = s * (1.0 / d)
    # Unbiased variance (ddof=1), matching torch.std default. Clamp for rounding.
    var = jnp.maximum(ss - s * mean, 0.0) * (1.0 / (d - 1))
    std = jnp.sqrt(var)

    # EUP reciprocal + broadcast multiply instead of a full-tile VALU divide.
    inv = pl.reciprocal(std + eps, approx=False)  # exact; use approx=True if ULPs ok

    alpha = alpha_ref[...].astype(jnp.float32)    # (1, D)
    bias = bias_ref[...].astype(jnp.float32)      # (1, D)
    out = (x - mean) * inv * alpha + bias
    o_ref[...] = out.astype(o_ref.dtype)


def _pick_tile_rows(rows, d, dtype, max_block_bytes=2 * 1024 * 1024):
    """Largest row tile that (a) keeps the block within ~2 MiB so double-buffered
    in+out blocks fit every TPU generation's default scoped VMEM, and (b) is a
    multiple of the sublane packing for the dtype (8 f32 / 16 bf16 / 32 int8)."""
    itemsize = jnp.dtype(dtype).itemsize
    pack = max(8, 32 // itemsize)
    t = max_block_bytes // max(1, d * itemsize)
    t = (t // pack) * pack
    t = max(pack, min(t, 1024))
    # No point in a block taller than the (packing-rounded) row count.
    rows_ceil = ((rows + pack - 1) // pack) * pack
    return min(t, rows_ceil)


def norm_forward(x, alpha, bias, *, eps=1e-6, tile_rows=None):
    """x: (..., D); alpha, bias: (D,). Returns same shape/dtype as x."""
    orig_shape = x.shape
    d = orig_shape[-1]
    x2 = x.reshape(-1, d)
    rows = x2.shape[0]

    if tile_rows is None:
        tile_rows = _pick_tile_rows(rows, d, x2.dtype)

    alpha2 = alpha.reshape(1, d)
    bias2 = bias.reshape(1, d)

    grid = (pl.cdiv(rows, tile_rows),)  # partial last block handled by Pallas
    out = pl.pallas_call(
        functools.partial(_norm_kernel, eps=eps),
        out_shape=jax.ShapeDtypeStruct((rows, d), x.dtype),
        grid_spec=pltpu.PrefetchScalarGridSpec(
            num_scalar_prefetch=0,
            grid=grid,
            in_specs=[
                pl.BlockSpec((tile_rows, d), lambda i: (i, 0)),
                pl.BlockSpec((1, d), lambda i: (0, 0)),
                pl.BlockSpec((1, d), lambda i: (0, 0)),
            ],
            out_specs=pl.BlockSpec((tile_rows, d), lambda i: (i, 0)),
        ),
        compiler_params=pltpu.CompilerParams(
            dimension_semantics=("parallel",),  # row blocks shard across TCs (v7x)
        ),
    )(x2, alpha2, bias2)

    return out.reshape(orig_shape)


def _reference(x, alpha, bias, eps=1e-6):
    d = x.shape[-1]
    mean = jnp.mean(x, axis=-1, keepdims=True)
    std = jnp.sqrt(jnp.sum((x - mean) ** 2, axis=-1, keepdims=True) / (d - 1))
    return alpha * (x - mean) / (std + eps) + bias


if __name__ == "__main__":
    B, S, D = 2, 8, 32
    key = jax.random.PRNGKey(0)
    x = jax.random.normal(key, (B, S, D), dtype=jnp.float32)

    # nn.Parameter(torch.ones(d_model)) / nn.Parameter(torch.zeros(d_model))
    alpha = jnp.ones((D,), dtype=jnp.float32)
    bias = jnp.zeros((D,), dtype=jnp.float32)

    out = norm_forward(x, alpha, bias)
    out = jax.block_until_ready(out)
    ref = _reference(x, alpha, bias)
    assert jnp.allclose(out, ref, atol=2e-5, rtol=2e-5), "mismatch vs reference"

    # Exercise the partial-last-block path (no host padding): 24 rows, 16-row tiles.
    x2 = jax.random.normal(jax.random.PRNGKey(1), (3, 8, D), dtype=jnp.float32)
    out2 = jax.block_until_ready(norm_forward(x2, alpha, bias, tile_rows=16))
    ref2 = _reference(x2, alpha, bias)
    assert jnp.allclose(out2, ref2, atol=2e-5, rtol=2e-5), "mismatch (partial block)"

    print("KERNEL_OK")
</pallas_src>

<mosaic_0001>
module attributes {stable_mosaic.version = 11 : i64} {
  func.func @_norm_kernel(%arg0: i32, %arg1: memref<16x32xf32, #tpu.memory_space<vmem>>, %arg2: memref<1x32xf32, #tpu.memory_space<vmem>>, %arg3: memref<1x32xf32, #tpu.memory_space<vmem>>, %arg4: memref<16x32xf32, #tpu.memory_space<vmem>>) attributes {dimension_semantics = [#tpu.dimension_semantics<parallel>], iteration_bounds = array<i64: 1>, scalar_prefetch = 0 : i64, scratch_operands = 0 : i64, tpu.core_type = #tpu.core_type<tc>, window_params = [{transform_indices = @transform_0, window_bounds = array<i64: 16, 32>}, {pipeline_mode = #tpu.pipeline_mode<synchronous>, transform_indices = @transform_1, window_bounds = array<i64: 1, 32>}, {pipeline_mode = #tpu.pipeline_mode<synchronous>, transform_indices = @transform_2, window_bounds = array<i64: 1, 32>}, {transform_indices = @transform_3, window_bounds = array<i64: 16, 32>}]} {
    %c0 = arith.constant 0 : index
    %c0_0 = arith.constant 0 : index
    %0 = vector.load %arg1[%c0, %c0_0] : memref<16x32xf32, #tpu.memory_space<vmem>>, vector<16x32xf32>
    %cst = arith.constant dense<0.000000e+00> : vector<16xf32>
    %1 = vector.multi_reduction <add>, %0, %cst [1] : vector<16x32xf32> to vector<16xf32>
    %2 = vector.shape_cast %1 : vector<16xf32> to vector<16x1xf32>
    %3 = arith.mulf %0, %0 : vector<16x32xf32>
    %cst_1 = arith.constant dense<0.000000e+00> : vector<16xf32>
    %4 = vector.multi_reduction <add>, %3, %cst_1 [1] : vector<16x32xf32> to vector<16xf32>
    %5 = vector.shape_cast %4 : vector<16xf32> to vector<16x1xf32>
    %cst_2 = arith.constant 3.125000e-02 : f32
    %6 = vector.broadcast %cst_2 : f32 to vector<16x1xf32>
    %7 = arith.mulf %2, %6 : vector<16x1xf32>
    %8 = arith.mulf %2, %7 : vector<16x1xf32>
    %9 = arith.subf %5, %8 : vector<16x1xf32>
    %cst_3 = arith.constant 0.000000e+00 : f32
    %10 = vector.broadcast %cst_3 : f32 to vector<16x1xf32>
    %11 = arith.maximumf %9, %10 : vector<16x1xf32>
    %cst_4 = arith.constant 0.0322580636 : f32
    %12 = vector.broadcast %cst_4 : f32 to vector<16x1xf32>
    %13 = arith.mulf %11, %12 : vector<16x1xf32>
    %14 = math.sqrt %13 : vector<16x1xf32>
    %cst_5 = arith.constant 9.99999997E-7 : f32
    %15 = vector.broadcast %cst_5 : f32 to vector<16x1xf32>
    %16 = arith.addf %14, %15 : vector<16x1xf32>
    %17 = tpu.reciprocal %16 : vector<16x1xf32> -> vector<16x1xf32>
    %c0_6 = arith.constant 0 : index
    %c0_7 = arith.constant 0 : index
    %18 = vector.load %arg2[%c0_6, %c0_7] : memref<1x32xf32, #tpu.memory_space<vmem>>, vector<1x32xf32>
    %c0_8 = arith.constant 0 : index
    %c0_9 = arith.constant 0 : index
    %19 = vector.load %arg3[%c0_8, %c0_9] : memref<1x32xf32, #tpu.memory_space<vmem>>, vector<1x32xf32>
    %20 = vector.broadcast %7 : vector<16x1xf32> to vector<16x32xf32>
    %21 = arith.subf %0, %20 : vector<16x32xf32>
    %22 = vector.broadcast %17 : vector<16x1xf32> to vector<16x32xf32>
    %23 = arith.mulf %21, %22 : vector<16x32xf32>
    %24 = vector.broadcast %18 : vector<1x32xf32> to vector<16x32xf32>
    %25 = arith.mulf %23, %24 : vector<16x32xf32>
    %26 = vector.broadcast %19 : vector<1x32xf32> to vector<16x32xf32>
    %27 = arith.addf %25, %26 : vector<16x32xf32>
    %c0_10 = arith.constant 0 : index
    %c0_11 = arith.constant 0 : index
    %28 = vector.load %arg4[%c0_10, %c0_11] : memref<16x32xf32, #tpu.memory_space<vmem>>, vector<16x32xf32>
    tpu.vector_store %arg4[%c0_10, %c0_11], %27 {strides = array<i32>} : memref<16x32xf32, #tpu.memory_space<vmem>>, vector<16x32xf32>,
    return
  }
  func.func @transform_0(%arg0: i32) -> (i32, i32) {
    %c0_i32 = arith.constant 0 : i32
    %c0_i32_0 = arith.constant 0 : i32
    return %arg0, %c0_i32 : i32, i32
  }
  func.func @transform_1(%arg0: i32) -> (i32, i32) {
    %c0_i32 = arith.constant 0 : i32
    %c0_i32_0 = arith.constant 0 : i32
    %c0_i32_1 = arith.constant 0 : i32
    return %c0_i32, %c0_i32_0 : i32, i32
  }
  func.func @transform_2(%arg0: i32) -> (i32, i32) {
    %c0_i32 = arith.constant 0 : i32
    %c0_i32_0 = arith.constant 0 : i32
    %c0_i32_1 = arith.constant 0 : i32
    return %c0_i32, %c0_i32_0 : i32, i32
  }
  func.func @transform_3(%arg0: i32) -> (i32, i32) {
    %c0_i32 = arith.constant 0 : i32
    %c0_i32_0 = arith.constant 0 : i32
    return %arg0, %c0_i32 : i32, i32
  }
}

</mosaic_0001>

<bundles_post_ra>
// kernel: tpu_custom_call.1
= control target key start
LH: loop header
LB: loop body
LE: loop exit
PB: predicated region body
PF: predicated region fallthrough
CT: control target
= control target key end

     0   :  { %8 = vsyncpa [#allocation3], 0  ;;  %s243_s0 = inlined_call_operand.hbm [shape: f32[16,32], index: 0, kind: input, shape index: {}]   ;;  %s244_s1 = inlined_call_operand.vmem [shape: f32[1,32], index: 1, kind: input, shape index: {}]   ;;  %s245_s2 = inlined_call_operand.vmem [shape: f32[1,32], index: 2, kind: input, shape index: {}]   ;;  %s246_s3 = inlined_call_operand.hbm [shape: f32[16,32], index: 3, kind: output, shape index: {}]  }
   0x1   :  { %9 = vsyncpa [#allocation4], 0  ;;  %s177_s12 = smov [#allocation2]   ;;  %s129_s16 = scalar_lea.hbm %s243_s0, 256 }
   0x2   :  { %s15_s13 = sshll.u32 %s177_s12, 4  ;;  %p130_p0 = scmp.ne.s32.totalorder %s243_s0, %s129_s16  ;;  %s16_s13 = int_to_ptr.vmem [resolvable:$true] %s15_s13 }
   0x3   :  { %p133_p1 = scmp.lt.u32.totalorder %s129_s16, %s243_s0 }
   0x5   :  { %p135_p2 = pnand %p133_p1, %p130_p0 }
   0x7   :  { %138 = shalt.err (!%p135_p2)
}
   0x8   :  { %s139_s21 = scalar_lea.vmem %s16_s13, 256  ;;  %p144_p4 = scmp.lt.s32.totalorder %s16_s13, %s16_s13 }
   0x9   :  { %p140_p3 = scmp.ne.s32.totalorder %s16_s13, %s139_s21  ;;  %p145_p5 = scmp.lt.s32.totalorder %s139_s21, %s139_s21 }
   0xb   :  { %p146_p6 = por %p145_p5, %p144_p4 }
   0xd   :  { %p147_p7 = pnand %p146_p6, %p140_p3 }
   0xf   :  { %150 = shalt.err (!%p147_p7)
}
  0x10   :  { %s178_s22 = smov 128   ;;  %s179_s23 = smov 8  }
  0x11   :  { %21 = dma.hbm_to_vmem [thread:$0]  %s243_s0, 256, %s16_s13, [#allocation3], %s178_s22, %s178_s22, %s179_s23  }
  0x12   :  { %173 = dma.done.wait [#allocation3], 256  }
  0x13   :  { %174 = vsyncadd [#allocation3], 4294967040  ;;  %vm31_vm0 = vcmask 261120   ;;  %v29_v0 = vld [vmem:[#allocation2] sm:$0xff]  ;;  %v30_v1 = vld [vmem:[#allocation2 + $0x8] sm:$0xff]  ;;  %s180_s29 = smov [#allocation5]  }
  0x14   :  { %v32_v2 = vsel %vm31_vm0, %v29_v0, 0.0  ;;  %v38_v3 = vmul.f32 %v29_v0, %v29_v0  ;;  %v39_v4 = vmul.f32 %v30_v1, %v30_v1  ;;  %v35_v6 = vsel %vm31_vm0, %v30_v1, 0.0  ;;  %v115_v36 = vld [vmem:[%s244_s1] ss:$0 sm:$0xff]  ;;  %s103_s30 = sshll.u32 %s180_s29, 4  ;;  %s104_s30 = int_to_ptr.vmem [resolvable:$true] %s103_s30 }
  0x15   :  { %33 = vadd.xlane.f32.xlu0 %v32_v2  ;;  %v116_v38 = vld [vmem:[%s245_s2] ss:$0 sm:$0xff]  ;;  %s151_s1 = scalar_lea.vmem %s104_s30, 256  ;;  %p156_p9 = scmp.lt.s32.totalorder %s104_s30, %s104_s30 }
  0x16   :  { %v40_v5 = vsel %vm31_vm0, %v38_v3, 0.0  ;;  %v43_v7 = vsel %vm31_vm0, %v39_v4, 0.0  ;;  %p152_p8 = scmp.ne.s32.totalorder %s104_s30, %s151_s1  ;;  %p157_p10 = scmp.lt.s32.totalorder %s151_s1, %s151_s1 }
  0x17   :  { %41 = vadd.xlane.f32.xlu1 %v40_v5 }
  0x18   :  { %p158_p11 = por %p157_p10, %p156_p9 }
  0x19   :  { %36 = vadd.xlane.f32.xlu0 %v35_v6 }
  0x1a   :  { %p159_p12 = pnand %p158_p11, %p152_p8 }
  0x1b   :  { %44 = vadd.xlane.f32.xlu1 %v43_v7 }
  0xa2   :  { %v34_v8 = vpop.xlane.xlu0 %33 }
  0xa3   :  { %v46_v9 = vmul.f32 0.03125, %v34_v8 }
  0xa4   :  { %v42_v10 = vpop.xlane.xlu1 %41 }
  0xa5   :  { %v48_v11 = vmul.f32 %v46_v9, %v34_v8  ;;  %v76_v34 = vsub.f32 %v29_v0, %v46_v9 }
  0xa6   :  { %v37_v12 = vpop.xlane.xlu0 %36 }
  0xa7   :  { %v50_v13 = vsub.f32 %v42_v10, %v48_v11  ;;  %v47_v14 = vmul.f32 0.03125, %v37_v12 }
  0xa8   :  { %v45_v15 = vpop.xlane.xlu1 %44 }
  0xa9   :  { %v52_v16 = vmax.f32 %v50_v13, 0.0  ;;  %v49_v17 = vmul.f32 %v47_v14, %v37_v12  ;;  %v77_v40 = vsub.f32 %v30_v1, %v47_v14 }
  0xab   :  { %v54_v18 = vmul.f32 0.032258064, %v52_v16  ;;  %v51_v19 = vsub.f32 %v45_v15, %v49_v17 }
  0xad   :  { %121 = vrsqrt.f32 %v54_v18  ;;  %v53_v20 = vmax.f32 %v51_v19, 0.0  ;;  %vm58_vm1 = vcmp.eq.f32.partialorder %v54_v18, inf  ;;  %v61_v24 = vand.u32 2147483648, %v54_v18 }
  0xae   :  { %vm60_vm2 = vcmp.eq.f32.partialorder %v54_v18, 0.0 }
  0xaf   :  { %v55_v21 = vmul.f32 0.032258064, %v53_v20 }
  0xb1   :  { %123 = vrsqrt.f32 %v55_v21  ;;  %vm65_vm3 = vcmp.eq.f32.partialorder %v55_v21, inf  ;;  %v68_v30 = vand.u32 2147483648, %v55_v21  ;;  %vm67_vm4 = vcmp.eq.f32.partialorder %v55_v21, 0.0 }
  0xb7   :  { %v122_v22 = vpop.eup %121 }
  0xb8   :  { %v57_v23 = vmul.f32 %v122_v22, %v54_v18 }
  0xba   :  { %v59_v25 = vsel %vm58_vm1, %v54_v18, %v57_v23 }
  0xbb   :  { %v62_v26 = vsel %vm60_vm2, %v61_v24, %v59_v25  ;;  %v124_v27 = vpop.eup %123 }
  0xbc   :  { %v70_v28 = vadd.f32 1e-06, %v62_v26  ;;  %v64_v29 = vmul.f32 %v124_v27, %v55_v21 }
  0xbe   :  { %125 = vrcp.f32 %v70_v28  ;;  %v66_v31 = vsel %vm65_vm3, %v55_v21, %v64_v29 }
  0xbf   :  { %v69_v32 = vsel %vm67_vm4, %v68_v30, %v66_v31 }
  0xc0   :  { %v71_v33 = vadd.f32 1e-06, %v69_v32 }
  0xc2   :  { %127 = vrcp.f32 %v71_v33 }
  0xc8   :  { %v126_v35 = vpop.eup %125 }
  0xc9   :  { %v78_v37 = vmul.f32 %v126_v35, %v76_v34 }
  0xcb   :  { %v86_v39 = vmul.f32 %v115_v36, %v78_v37 }
  0xcc   :  { %v128_v41 = vpop.eup %127 }
  0xcd   :  { %v94_v42 = vadd.f32 %v116_v38, %v86_v39  ;;  %v79_v43 = vmul.f32 %v128_v41, %v77_v40 }
  0xcf   :  { %96 = vst.msk [vmem:[#allocation5] sm:$0xff] %vm31_vm0, %v94_v42  ;;  %v87_v44 = vmul.f32 %v115_v36, %v79_v43 }
  0xd1   :  { %v95_v45 = vadd.f32 %v116_v38, %v87_v44 }
  0xd3   :  { %97 = vst.msk [vmem:[#allocation5 + $0x8] sm:$0xff] %vm31_vm0, %v95_v45 }
  0xd4   :  { %162 = shalt.err (!%p159_p12)
}
  0xd5   :  { %s163_s5 = scalar_lea.hbm %s246_s3, 256 }
  0xd6   :  { %p164_p13 = scmp.ne.s32.totalorder %s246_s3, %s163_s5  ;;  %p167_p0 = scmp.lt.u32.totalorder %s163_s5, %s246_s3 }
  0xd8   :  { %p169_p1 = pnand %p167_p0, %p164_p13 }
  0xda   :  { %172 = shalt.err (!%p169_p1)
}
  0xdb   :  { %109 = dma.vmem_to_hbm [thread:$0]  %s104_s30, 256, %s246_s3, [#allocation4], %s178_s22, %s178_s22, %s179_s23  }
  0xdc   :  { %175 = dma.done.wait [#allocation4], 256  }
  0xdd   :  { %176 = vsyncadd [#allocation4], 4294967040 }
  0xde   :  { %113 = vsyncpa [#allocation3], 1 }
  0xdf   :  { %114 = vsyncpa [#allocation4], 1 }

</bundles_post_ra>
